<compile_context>
chip_gen: v5e
topology: v5e:2x2
jax: 0.10.0
libtpu: 0.0.40
codegen_flags: <defaults>
</compile_context>

<pallas_src>
import jax
import jax.numpy as jnp
from jax import lax
from jax.experimental import pallas as pl
from jax.experimental.pallas import tpu as pltpu

IN_FEATURES = 10
OUT_FEATURES = 10
SUBLANE = 8     # f32 sublane count
NUM_TC = 2      # v7x has 2 TensorCores; harmless on v5e/v6e


def _round_up(x, m):
    return ((x + m - 1) // m) * m


def linear_kernel(x_ref, w_ref, b_ref, o_ref):
    # x_ref: (TB, IN)    VMEM batch tile, f32
    # w_ref: (OUT, IN)   VMEM, native PyTorch layout, resident across tiles
    # b_ref: (1, OUT)    VMEM, resident
    # o_ref: (TB, OUT)   VMEM output tile
    # bf16 operands for the MXU (cast right before the dot), f32 accumulation.
    xb = x_ref[...].astype(jnp.bfloat16)
    wb = w_ref[...].astype(jnp.bfloat16)
    acc = lax.dot_general(
        xb, wb,
        dimension_numbers=(((1,), (1,)), ((), ())),   # contract IN with IN
        preferred_element_type=jnp.float32)
    # Bias add + store stay in f32 (v5e-friendly epilogue).
    o_ref[...] = (acc + b_ref[...]).astype(o_ref.dtype)


def linear_forward(x, weight, bias, *, block_b=2048):
    """y = x @ weight.T + bias  (PyTorch nn.Linear semantics)."""
    B, in_f = x.shape
    out_f, w_in = weight.shape
    assert w_in == in_f, "weight shape must be (out_features, in_features)"

    bias2d = bias.reshape(1, out_f)

    # Batch tile: multiple of 8 sublanes, large enough to amortize grid-step
    # overhead, but capped so the parallel axis has >= NUM_TC steps when B is
    # big enough (keeps v7x's second TensorCore busy).
    b_min = _round_up(B, SUBLANE)
    tb = min(block_b, max(SUBLANE, _round_up(pl.cdiv(b_min, NUM_TC), SUBLANE)))
    b_pad = _round_up(B, tb)

    # Only pad the batch dim, and only when B isn't already a tile multiple.
    x_in = x if b_pad == B else jnp.pad(x, ((0, b_pad - B), (0, 0)))

    cost = pl.CostEstimate(
        flops=2 * B * in_f * out_f,
        transcendentals=0,
        bytes_accessed=4 * (b_pad * in_f + out_f * in_f + out_f
                            + b_pad * out_f))

    y = pl.pallas_call(
        linear_kernel,
        out_shape=jax.ShapeDtypeStruct((b_pad, out_f), x.dtype),
        grid_spec=pl.GridSpec(
            grid=(b_pad // tb,),
            in_specs=[
                pl.BlockSpec((tb, in_f), lambda i: (i, 0)),     # x batch tile
                pl.BlockSpec((out_f, in_f), lambda i: (0, 0)),  # resident W
                pl.BlockSpec((1, out_f), lambda i: (0, 0)),     # resident b
            ],
            out_specs=pl.BlockSpec((tb, out_f), lambda i: (i, 0)),
        ),
        compiler_params=pltpu.CompilerParams(
            dimension_semantics=("parallel",),
            vmem_limit_bytes=32 * 1024 * 1024),
        cost_estimate=cost,
    )(x_in, weight, bias2d)

    return y if b_pad == B else y[:B]


if __name__ == "__main__":
    key = jax.random.PRNGKey(0)
    kx, kw, kb = jax.random.split(key, 3)

    # Deterministic inputs, shapes implied by nn.Linear(10, 10).
    batch = 8
    x = jax.random.normal(kx, (batch, IN_FEATURES), dtype=jnp.float32)
    # PyTorch default init: U(-1/sqrt(in), 1/sqrt(in)).
    bound = 1.0 / (IN_FEATURES ** 0.5)
    weight = jax.random.uniform(
        kw, (OUT_FEATURES, IN_FEATURES), dtype=jnp.float32,
        minval=-bound, maxval=bound)
    bias = jax.random.uniform(
        kb, (OUT_FEATURES,), dtype=jnp.float32, minval=-bound, maxval=bound)

    y = linear_forward(x, weight, bias)
    jax.block_until_ready(y)

    # f32 reference; tolerance loosened because MXU operands are bf16
    # (K=10 dot -> error well below 1e-2 for these magnitudes).
    y_ref = x @ weight.T + bias
    assert y.shape == y_ref.shape, "shape mismatch vs reference"
    assert jnp.allclose(y, y_ref, atol=3e-2, rtol=3e-2), "mismatch vs reference"

    print("KERNEL_OK")
</pallas_src>

<mosaic_0001>
module attributes {stable_mosaic.version = 11 : i64} {
  func.func @linear_kernel(%arg0: i32, %arg1: memref<8x10xf32, #tpu.memory_space<vmem>>, %arg2: memref<10x10xf32, #tpu.memory_space<vmem>>, %arg3: memref<1x10xf32, #tpu.memory_space<vmem>>, %arg4: memref<8x10xf32, #tpu.memory_space<vmem>>) attributes {dimension_semantics = [#tpu.dimension_semantics<parallel>], iteration_bounds = array<i64: 1>, scalar_prefetch = 0 : i64, scratch_operands = 0 : i64, tpu.core_type = #tpu.core_type<tc>, window_params = [{transform_indices = @transform_0, window_bounds = array<i64: 8, 10>}, {pipeline_mode = #tpu.pipeline_mode<synchronous>, transform_indices = @transform_1, window_bounds = array<i64: 10, 10>}, {pipeline_mode = #tpu.pipeline_mode<synchronous>, transform_indices = @transform_2, window_bounds = array<i64: 1, 10>}, {transform_indices = @transform_3, window_bounds = array<i64: 8, 10>}]} {
    %c0 = arith.constant 0 : index
    %c0_0 = arith.constant 0 : index
    %0 = vector.load %arg1[%c0, %c0_0] : memref<8x10xf32, #tpu.memory_space<vmem>>, vector<8x10xf32>
    %1 = arith.truncf %0 : vector<8x10xf32> to vector<8x10xbf16>
    %c0_1 = arith.constant 0 : index
    %c0_2 = arith.constant 0 : index
    %2 = vector.load %arg2[%c0_1, %c0_2] : memref<10x10xf32, #tpu.memory_space<vmem>>, vector<10x10xf32>
    %3 = arith.truncf %2 : vector<10x10xf32> to vector<10x10xbf16>
    %cst = arith.constant dense<0.000000e+00> : vector<8x10xf32>
    %4 = tpu.matmul %1, %3, %cst {dimension_numbers = #tpu.dot_dimension_numbers<[1], [1], [0], [0], [0, 0, 1, 0], [], []>} : vector<8x10xbf16>, vector<10x10xbf16>, vector<8x10xf32> -> vector<8x10xf32>
    %c0_3 = arith.constant 0 : index
    %c0_4 = arith.constant 0 : index
    %5 = vector.load %arg3[%c0_3, %c0_4] : memref<1x10xf32, #tpu.memory_space<vmem>>, vector<1x10xf32>
    %6 = vector.broadcast %5 : vector<1x10xf32> to vector<8x10xf32>
    %7 = arith.addf %4, %6 : vector<8x10xf32>
    %c0_5 = arith.constant 0 : index
    %c0_6 = arith.constant 0 : index
    %8 = vector.load %arg4[%c0_5, %c0_6] : memref<8x10xf32, #tpu.memory_space<vmem>>, vector<8x10xf32>
    tpu.vector_store %arg4[%c0_5, %c0_6], %7 {strides = array<i32>} : memref<8x10xf32, #tpu.memory_space<vmem>>, vector<8x10xf32>,
    return
  }
  func.func @transform_0(%arg0: i32) -> (i32, i32) {
    %c0_i32 = arith.constant 0 : i32
    %c0_i32_0 = arith.constant 0 : i32
    return %arg0, %c0_i32 : i32, i32
  }
  func.func @transform_1(%arg0: i32) -> (i32, i32) {
    %c0_i32 = arith.constant 0 : i32
    %c0_i32_0 = arith.constant 0 : i32
    %c0_i32_1 = arith.constant 0 : i32
    return %c0_i32, %c0_i32_0 : i32, i32
  }
  func.func @transform_2(%arg0: i32) -> (i32, i32) {
    %c0_i32 = arith.constant 0 : i32
    %c0_i32_0 = arith.constant 0 : i32
    %c0_i32_1 = arith.constant 0 : i32
    return %c0_i32, %c0_i32_0 : i32, i32
  }
  func.func @transform_3(%arg0: i32) -> (i32, i32) {
    %c0_i32 = arith.constant 0 : i32
    %c0_i32_0 = arith.constant 0 : i32
    return %arg0, %c0_i32 : i32, i32
  }
}

</mosaic_0001>

<bundles_post_ra>
// kernel: tpu_custom_call.1
= control target key start
LH: loop header
LB: loop body
LE: loop exit
PB: predicated region body
PF: predicated region fallthrough
CT: control target
= control target key end

     0   :  { %8 = vsyncpa [#allocation3], 0  ;;  %s216_s0 = inlined_call_operand.hbm [shape: f32[8,10], index: 0, kind: input, shape index: {}]   ;;  %s217_s1 = inlined_call_operand.hbm [shape: f32[10,10], index: 1, kind: input, shape index: {}]   ;;  %s218_s2 = inlined_call_operand.vmem [shape: f32[1,10], index: 2, kind: input, shape index: {}]   ;;  %s219_s3 = inlined_call_operand.hbm [shape: f32[8,10], index: 3, kind: output, shape index: {}]  }
   0x1   :  { %9 = vsyncpa [#allocation6], 0 }
   0x2   :  { %10 = vsyncpa [#allocation4], 0  ;;  %s16_s14 = sshll.u32 %s216_s0, 4  ;;  %s179_s15 = smov [#allocation2]   ;;  %s17_s14 = int_to_ptr.hbm [resolvable:$true] %s16_s14 }
   0x3   :  { %s18_s16 = sshll.u32 %s179_s15, 4  ;;  %s26_s19 = sshll.u32 %s217_s1, 4  ;;  %s19_s16 = int_to_ptr.vmem [resolvable:$true] %s18_s16  ;;  %s27_s19 = int_to_ptr.hbm [resolvable:$true] %s26_s19 }
   0x4   :  { %21 = dma.hbm_to_vmem [thread:$0]  %s17_s14, 128, %s19_s16, [#allocation3]  }
   0x5   :  { %s180_s20 = smov [#allocation5]   ;;  %s181_s22 = smov 128  }
   0x6   :  { %s28_s21 = sshll.u32 %s180_s20, 4  ;;  %s182_s23 = smov 8   ;;  %s29_s21 = int_to_ptr.vmem [resolvable:$true] %s28_s21 }
   0x7   :  { %34 = dma.hbm_to_vmem [thread:$0]  %s27_s19, 256, %s29_s21, [#allocation6], %s181_s22, %s181_s22, %s182_s23  }
   0x8   :  { %173 = dma.done.wait [#allocation3], 128  }
   0x9   :  { %174 = vsyncadd [#allocation3], 4294967168 }
   0xa   :  { %175 = dma.done.wait [#allocation6], 256  }
   0xb   :  { %176 = vsyncadd [#allocation6], 4294967040  ;;  %v48_v0 = vld [vmem:[#allocation5] sm:$0xff]  ;;  %v49_v1 = vld [vmem:[#allocation5 + $0x8] sm:$0x3]  ;;  %vm55_vm0 = vcmask 80896  }
   0xc   :  { %v50_v2 = vpack.c.bf16 %v49_v1, %v48_v0  ;;  %v46_v4 = vld [vmem:[#allocation2] sm:$0xff]  ;;  %s183_s24 = smov [#allocation7]   ;;  %s83_s28 = sshll.u32 %s219_s3, 4  ;;  %s84_s28 = int_to_ptr.hbm [resolvable:$true] %s83_s28 }
   0xd   :  { %v47_v5 = vpack.c.bf16 %v46_v4, %v46_v4  ;;  %v100_v6 = vld [vmem:[%s218_s2] ss:$0 sm:$0xff]  ;;  %s81_s25 = sshll.u32 %s183_s24, 4  ;;  %s82_s25 = int_to_ptr.vmem [resolvable:$true] %s81_s25 }
   0xe   :  { %v60_v3 = vsel %vm55_vm0, %v50_v2, 0 }
   0xf   :  { %69 = vmatpush.bf16.xpose.msra.mxu0 %v60_v3 }
  0x16   :  { %94 = vmatmul.msk.bf16.vlgmr.msra.gmra.mxu0 %vm55_vm0, %v47_v5 }
  0x93   :  { %v71_v7 = vpop.f32.mrf.mxu0 }
  0x94   :  { %v72_v8 = vadd.f32 %v100_v6, %v71_v7 }
  0x96   :  { %75 = vst.msk [vmem:[#allocation7] sm:$0xff] %vm55_vm0, %v72_v8 }
  0x97   :  { %86 = dma.vmem_to_hbm [thread:$0]  %s82_s25, 128, %s84_s28, [#allocation4]  }
  0x9b   :  { %v73_v9 = vpop.f32.mrf.mxu0 }
  0x9c   :  { %177 = dma.done.wait [#allocation4], 128  }
  0x9d   :  { %178 = vsyncadd [#allocation4], 4294967168 }
  0x9e   :  { %91 = vsyncpa [#allocation3], 1 }
  0x9f   :  { %92 = vsyncpa [#allocation6], 1 }
  0xa0   :  { %93 = vsyncpa [#allocation4], 1 }

</bundles_post_ra>
